<compile_context>
chip_gen: v5e
topology: v5e:2x2
jax: 0.10.0
libtpu: 0.0.40
codegen_flags: <defaults>
</compile_context>

<pallas_src>
import jax
import jax.numpy as jnp
from jax.experimental import pallas as pl
from jax.experimental.pallas import tpu as pltpu

TEMPERATURE = 10.0
EPS = 1e-8


def _global_loss_kernel(img_ref, txt_ref, inv_txt_row_ref, inv_txt_col_ref,
                        i2t_ref, dsum_ref, csum_ref):
    i = pl.program_id(0)
    tm = img_ref.shape[0]                    # static row-block size

    img = img_ref[...]                       # (TM, D), native dtype for the MXU
    txt = txt_ref[...]                       # (B,  D), resident across blocks
    img_f32 = img.astype(jnp.float32)

    # Per-row image inverse norms (f32); text norms are hoisted to the wrapper.
    img_norm = jnp.sqrt(jnp.sum(img_f32 * img_f32, axis=-1, keepdims=True))   # (TM,1)
    inv_img = 1.0 / jnp.maximum(img_norm, EPS)                                # (TM,1)

    # (TM, B) similarity strip on the MXU; contract D with D (no txt.T).
    sim = jax.lax.dot_general(
        img, txt, dimension_numbers=(((1,), (1,)), ((), ())),
        preferred_element_type=jnp.float32)

    # Rank-1 scaling: logits = sim / (||img|| * ||txt||) * TEMPERATURE, with
    # TEMPERATURE folded into the hoisted per-column factor.
    logits = sim * inv_img * inv_txt_row_ref[...]                             # (TM,B)

    # |logits| <= ~TEMPERATURE (cosine bounded by 1), so a single exp without
    # max-subtraction is numerically safe in f32; reused by both directions.
    e = jnp.exp(logits)                                                       # (TM,B)
    lse_row = jnp.log(jnp.sum(e, axis=-1, keepdims=True))                     # (TM,1)

    # Matching-pair logit for this row block: row-wise dot with the aligned
    # text slice (no (B, B) diag mask, no transpose), scaled with the same
    # hoisted factors as the row logits.  (VPU dot vs. MXU row: negligible
    # numeric difference at f32.)
    start = pl.multiple_of(i * tm, tm)
    txt_d = txt_ref[pl.ds(start, tm), :].astype(jnp.float32)                  # (TM,D)
    diag_sim = jnp.sum(img_f32 * txt_d, axis=-1, keepdims=True)               # (TM,1)
    diag = diag_sim * inv_img * inv_txt_col_ref[...]                          # (TM,1)

    # cross_entropy reduces with a mean, so only per-block partial sums and
    # the lane-dense per-block column sum-of-exp need to leave the kernel.
    i2t_ref[...] = jnp.sum(lse_row - diag, axis=0, keepdims=True).reshape(1, 1, 1)
    dsum_ref[...] = jnp.sum(diag, axis=0, keepdims=True).reshape(1, 1, 1)
    # Column partials (sublane reduce).  If a bundle dump ever shows this on
    # the critical slot, it can move to the (idle) MXU as ones((1, TM)) @ e.
    csum_ref[...] = jnp.sum(e, axis=0, keepdims=True).reshape(1, 1, -1)


# Working-set budget that also fits v7x's 64 MiB per-TensorCore VMEM.
_VMEM_BUDGET = 40 * 1024 * 1024


def _working_set_bytes(batch, dim, tm, itemsize):
    text = 2 * batch * dim * itemsize        # resident text (charged double-buffered)
    image = 2 * tm * dim * itemsize          # double-buffered image row block
    temps = 4 * tm * batch * 4               # f32 sim / logits / exp temporaries
    small = 8 * batch * 4 + 4096             # inv-norm inputs + col-sum output
    return text + image + temps + small


def _pick_row_block(batch, dim, itemsize):
    """Largest row block that (a) divides the batch, (b) gives >= 2 blocks so the
    'parallel' axis shards across both v7x TensorCores, (c) fits the budget."""
    for tm in (1024, 512, 256, 128, 64, 32, 16, 8):
        if (batch % tm == 0 and batch // tm >= 2
                and _working_set_bytes(batch, dim, tm, itemsize) <= _VMEM_BUDGET):
            return tm
    # Tiny or indivisible batch: single full-array block.  (For batches so
    # large that even TM=8 overflows the budget, the resident text itself no
    # longer fits VMEM; that would need a second, column-tiling grid axis with
    # an online row-LSE accumulator — not needed at these sizes.)
    return batch


def _vmem_limit_bytes(batch, dim, tm, itemsize):
    need = _working_set_bytes(batch, dim, tm, itemsize) + (4 << 20)   # headroom
    return int(min(max(need, 16 << 20), 64 << 20))


def global_loss(image_embeddings, text_embeddings):
    """Returns (image_to_text_loss, text_to_image_loss) as f32 scalars."""
    if image_embeddings.ndim == 3:           # accept (1, B, D) like the torch module
        image_embeddings = image_embeddings[0]
        text_embeddings = text_embeddings[0]
    B, D = image_embeddings.shape
    itemsize = jnp.dtype(image_embeddings.dtype).itemsize
    TM = _pick_row_block(B, D, itemsize)
    nb = B // TM

    # Hoisted text factors: TEMPERATURE / max(||txt||, eps), computed once in f32.
    # NOTE: torch clamps the norm *product* at eps; per-norm clamping differs
    # only when a norm is ~0.
    txt_f32 = text_embeddings.astype(jnp.float32)
    inv_txt = TEMPERATURE / jnp.maximum(
        jnp.sqrt(jnp.sum(txt_f32 * txt_f32, axis=-1)), EPS)                   # (B,)
    inv_txt_row = inv_txt.reshape(1, B)
    inv_txt_col = inv_txt.reshape(B, 1)

    i2t_part, diag_sum, csum = pl.pallas_call(
        _global_loss_kernel,
        out_shape=(
            jax.ShapeDtypeStruct((nb, 1, 1), jnp.float32),   # per-block sum(lse_row - diag)
            jax.ShapeDtypeStruct((nb, 1, 1), jnp.float32),   # per-block sum(diag)
            jax.ShapeDtypeStruct((nb, 1, B), jnp.float32),   # per-block column sum(exp)
        ),
        grid=(nb,),
        in_specs=[
            pl.BlockSpec((TM, D), lambda i: (i, 0)),         # image row block
            pl.BlockSpec((B, D), lambda i: (0, 0)),          # full text, resident
            pl.BlockSpec((1, B), lambda i: (0, 0)),          # TEMPERATURE/||txt|| (row)
            pl.BlockSpec((TM, 1), lambda i: (i, 0)),         # TEMPERATURE/||txt|| (col slice)
        ],
        out_specs=(
            pl.BlockSpec((1, 1, 1), lambda i: (i, 0, 0)),
            pl.BlockSpec((1, 1, 1), lambda i: (i, 0, 0)),
            pl.BlockSpec((1, 1, B), lambda i: (i, 0, 0)),
        ),
        compiler_params=pltpu.CompilerParams(
            dimension_semantics=("parallel",),
            vmem_limit_bytes=_vmem_limit_bytes(B, D, TM, itemsize),
        ),
    )(image_embeddings, text_embeddings, inv_txt_row, inv_txt_col)

    mean_diag = jnp.sum(diag_sum) / B

    # image -> text: mean over rows of (row-lse - matching logit).
    i2t = jnp.sum(i2t_part) / B

    # text -> image: merge per-block column exp-sums (no running max needed
    # since |logits| <= ~10), then subtract the mean matching logit.
    col_sum = jnp.sum(csum, axis=0).reshape(B)               # (B,)
    t2i = jnp.mean(jnp.log(col_sum)) - mean_diag
    return i2t, t2i


def _reference(image_embeddings, text_embeddings):
    """Pure-JAX reference mirroring the PyTorch forward."""
    img = image_embeddings.astype(jnp.float32)
    txt = text_embeddings.astype(jnp.float32)
    img_norm = jnp.linalg.norm(img, axis=-1, keepdims=True)
    txt_norm = jnp.linalg.norm(txt, axis=-1, keepdims=True)
    sim = img @ txt.T
    norm_factor = jnp.maximum(img_norm @ txt_norm.T, EPS)
    logits = sim / norm_factor * TEMPERATURE
    labels = jnp.arange(logits.shape[0])

    def ce(l):
        logp = jax.nn.log_softmax(l, axis=-1)
        return -jnp.mean(logp[jnp.arange(l.shape[0]), labels])

    return ce(logits), ce(logits.T)


if __name__ == "__main__":
    key = jax.random.PRNGKey(0)
    # First shape exercises the small multi-block path (TM=8, 2 row blocks);
    # the second a larger tiled path (TM=128, 2 row blocks).
    for batch, dim in ((16, 128), (256, 128)):
        k1, k2 = jax.random.split(jax.random.fold_in(key, batch))
        image_embeddings = jax.random.normal(k1, (batch, dim), dtype=jnp.float32)
        text_embeddings = jax.random.normal(k2, (batch, dim), dtype=jnp.float32)

        i2t, t2i = global_loss(image_embeddings, text_embeddings)
        jax.block_until_ready((i2t, t2i))

        ref_i2t, ref_t2i = _reference(image_embeddings, text_embeddings)
        assert jnp.allclose(i2t, ref_i2t, atol=1e-4, rtol=1e-4), (batch, i2t, ref_i2t)
        assert jnp.allclose(t2i, ref_t2i, atol=1e-4, rtol=1e-4), (batch, t2i, ref_t2i)

    print("KERNEL_OK")
</pallas_src>

<mosaic_0001>
module attributes {stable_mosaic.version = 11 : i64} {
  func.func @_global_loss_kernel(%arg0: i32, %arg1: memref<8x128xf32, #tpu.memory_space<vmem>>, %arg2: memref<16x128xf32, #tpu.memory_space<vmem>>, %arg3: memref<1x16xf32, #tpu.memory_space<vmem>>, %arg4: memref<8x1xf32, #tpu.memory_space<vmem>>, %arg5: memref<1x1x1xf32, #tpu.memory_space<vmem>>, %arg6: memref<1x1x1xf32, #tpu.memory_space<vmem>>, %arg7: memref<1x1x16xf32, #tpu.memory_space<vmem>>) attributes {dimension_semantics = [#tpu.dimension_semantics<parallel>], iteration_bounds = array<i64: 2>, scalar_prefetch = 0 : i64, scratch_operands = 0 : i64, tpu.core_type = #tpu.core_type<tc>, window_params = [{transform_indices = @transform_0, window_bounds = array<i64: 8, 128>}, {pipeline_mode = #tpu.pipeline_mode<synchronous>, transform_indices = @transform_1, window_bounds = array<i64: 16, 128>}, {pipeline_mode = #tpu.pipeline_mode<synchronous>, transform_indices = @transform_2, window_bounds = array<i64: 1, 16>}, {transform_indices = @transform_3, window_bounds = array<i64: 8, 1>}, {transform_indices = @transform_4, window_bounds = array<i64: 1, 1, 1>}, {transform_indices = @transform_5, window_bounds = array<i64: 1, 1, 1>}, {transform_indices = @transform_6, window_bounds = array<i64: 1, 1, 16>}]} {
    %c0 = arith.constant 0 : index
    %c0_0 = arith.constant 0 : index
    %0 = vector.load %arg1[%c0, %c0_0] : memref<8x128xf32, #tpu.memory_space<vmem>>, vector<8x128xf32>
    %c0_1 = arith.constant 0 : index
    %c0_2 = arith.constant 0 : index
    %1 = vector.load %arg2[%c0_1, %c0_2] : memref<16x128xf32, #tpu.memory_space<vmem>>, vector<16x128xf32>
    %2 = arith.mulf %0, %0 : vector<8x128xf32>
    %cst = arith.constant dense<0.000000e+00> : vector<8xf32>
    %3 = vector.multi_reduction <add>, %2, %cst [1] : vector<8x128xf32> to vector<8xf32>
    %4 = vector.shape_cast %3 : vector<8xf32> to vector<8x1xf32>
    %5 = math.sqrt %4 : vector<8x1xf32>
    %cst_3 = arith.constant 9.99999993E-9 : f32
    %6 = vector.broadcast %cst_3 : f32 to vector<8x1xf32>
    %7 = arith.maximumf %5, %6 : vector<8x1xf32>
    %cst_4 = arith.constant 1.000000e+00 : f32
    %8 = vector.broadcast %cst_4 : f32 to vector<8x1xf32>
    %9 = arith.divf %8, %7 : vector<8x1xf32>
    %cst_5 = arith.constant dense<0.000000e+00> : vector<8x16xf32>
    %10 = tpu.matmul %0, %1, %cst_5 {dimension_numbers = #tpu.dot_dimension_numbers<[1], [1], [0], [0], [0, 0, 1, 0], [], []>} : vector<8x128xf32>, vector<16x128xf32>, vector<8x16xf32> -> vector<8x16xf32>
    %11 = vector.broadcast %9 : vector<8x1xf32> to vector<8x16xf32>
    %12 = arith.mulf %10, %11 : vector<8x16xf32>
    %c0_6 = arith.constant 0 : index
    %c0_7 = arith.constant 0 : index
    %13 = vector.load %arg3[%c0_6, %c0_7] : memref<1x16xf32, #tpu.memory_space<vmem>>, vector<1x16xf32>
    %14 = vector.broadcast %13 : vector<1x16xf32> to vector<8x16xf32>
    %15 = arith.mulf %12, %14 : vector<8x16xf32>
    %16 = math.exp %15 : vector<8x16xf32>
    %cst_8 = arith.constant dense<0.000000e+00> : vector<8xf32>
    %17 = vector.multi_reduction <add>, %16, %cst_8 [1] : vector<8x16xf32> to vector<8xf32>
    %18 = vector.shape_cast %17 : vector<8xf32> to vector<8x1xf32>
    %19 = math.log %18 : vector<8x1xf32>
    %c8_i32 = arith.constant 8 : i32
    %20 = arith.muli %arg0, %c8_i32 : i32
    %21 = tpu.assume_multiple %20, 8 : i32
    %22 = arith.index_cast %21 : i32 to index
    %c0_9 = arith.constant 0 : index
    %23 = vector.load %arg2[%22, %c0_9] : memref<16x128xf32, #tpu.memory_space<vmem>>, vector<8x128xf32>
    %24 = arith.mulf %0, %23 : vector<8x128xf32>
    %cst_10 = arith.constant dense<0.000000e+00> : vector<8xf32>
    %25 = vector.multi_reduction <add>, %24, %cst_10 [1] : vector<8x128xf32> to vector<8xf32>
    %26 = vector.shape_cast %25 : vector<8xf32> to vector<8x1xf32>
    %27 = arith.mulf %26, %9 : vector<8x1xf32>
    %c0_11 = arith.constant 0 : index
    %c0_12 = arith.constant 0 : index
    %28 = vector.load %arg4[%c0_11, %c0_12] : memref<8x1xf32, #tpu.memory_space<vmem>>, vector<8x1xf32>
    %29 = arith.mulf %27, %28 : vector<8x1xf32>
    %30 = arith.subf %19, %29 : vector<8x1xf32>
    %cst_13 = arith.constant dense<0.000000e+00> : vector<1xf32>
    %31 = vector.multi_reduction <add>, %30, %cst_13 [0] : vector<8x1xf32> to vector<1xf32>
    %32 = vector.shape_cast %31 : vector<1xf32> to vector<1x1xf32>
    %33 = vector.shape_cast %32 : vector<1x1xf32> to vector<1x1x1xf32>
    %c0_14 = arith.constant 0 : index
    %c0_15 = arith.constant 0 : index
    %c0_16 = arith.constant 0 : index
    %34 = vector.load %arg5[%c0_14, %c0_15, %c0_16] : memref<1x1x1xf32, #tpu.memory_space<vmem>>, vector<1x1x1xf32>
    tpu.vector_store %arg5[%c0_14, %c0_15, %c0_16], %33 {strides = array<i32>} : memref<1x1x1xf32, #tpu.memory_space<vmem>>, vector<1x1x1xf32>,
    %cst_17 = arith.constant dense<0.000000e+00> : vector<1xf32>
    %35 = vector.multi_reduction <add>, %29, %cst_17 [0] : vector<8x1xf32> to vector<1xf32>
    %36 = vector.shape_cast %35 : vector<1xf32> to vector<1x1xf32>
    %37 = vector.shape_cast %36 : vector<1x1xf32> to vector<1x1x1xf32>
    %c0_18 = arith.constant 0 : index
    %c0_19 = arith.constant 0 : index
    %c0_20 = arith.constant 0 : index
    %38 = vector.load %arg6[%c0_18, %c0_19, %c0_20] : memref<1x1x1xf32, #tpu.memory_space<vmem>>, vector<1x1x1xf32>
    tpu.vector_store %arg6[%c0_18, %c0_19, %c0_20], %37 {strides = array<i32>} : memref<1x1x1xf32, #tpu.memory_space<vmem>>, vector<1x1x1xf32>,
    %cst_21 = arith.constant dense<0.000000e+00> : vector<16xf32>
    %39 = vector.multi_reduction <add>, %16, %cst_21 [0] : vector<8x16xf32> to vector<16xf32>
    %40 = vector.shape_cast %39 : vector<16xf32> to vector<1x16xf32>
    %41 = vector.shape_cast %40 : vector<1x16xf32> to vector<1x1x16xf32>
    %c0_22 = arith.constant 0 : index
    %c0_23 = arith.constant 0 : index
    %c0_24 = arith.constant 0 : index
    %42 = vector.load %arg7[%c0_22, %c0_23, %c0_24] : memref<1x1x16xf32, #tpu.memory_space<vmem>>, vector<1x1x16xf32>
    tpu.vector_store %arg7[%c0_22, %c0_23, %c0_24], %41 {strides = array<i32>} : memref<1x1x16xf32, #tpu.memory_space<vmem>>, vector<1x1x16xf32>,
    return
  }
  func.func @transform_0(%arg0: i32) -> (i32, i32) {
    %c0_i32 = arith.constant 0 : i32
    %c0_i32_0 = arith.constant 0 : i32
    return %arg0, %c0_i32 : i32, i32
  }
  func.func @transform_1(%arg0: i32) -> (i32, i32) {
    %c0_i32 = arith.constant 0 : i32
    %c0_i32_0 = arith.constant 0 : i32
    %c0_i32_1 = arith.constant 0 : i32
    return %c0_i32, %c0_i32_0 : i32, i32
  }
  func.func @transform_2(%arg0: i32) -> (i32, i32) {
    %c0_i32 = arith.constant 0 : i32
    %c0_i32_0 = arith.constant 0 : i32
    %c0_i32_1 = arith.constant 0 : i32
    return %c0_i32, %c0_i32_0 : i32, i32
  }
  func.func @transform_3(%arg0: i32) -> (i32, i32) {
    %c0_i32 = arith.constant 0 : i32
    %c0_i32_0 = arith.constant 0 : i32
    return %arg0, %c0_i32 : i32, i32
  }
  func.func @transform_4(%arg0: i32) -> (i32, i32, i32) {
    %c0_i32 = arith.constant 0 : i32
    %c0_i32_0 = arith.constant 0 : i32
    %c0_i32_1 = arith.constant 0 : i32
    return %arg0, %c0_i32, %c0_i32_0 : i32, i32, i32
  }
  func.func @transform_5(%arg0: i32) -> (i32, i32, i32) {
    %c0_i32 = arith.constant 0 : i32
    %c0_i32_0 = arith.constant 0 : i32
    %c0_i32_1 = arith.constant 0 : i32
    return %arg0, %c0_i32, %c0_i32_0 : i32, i32, i32
  }
  func.func @transform_6(%arg0: i32) -> (i32, i32, i32) {
    %c0_i32 = arith.constant 0 : i32
    %c0_i32_0 = arith.constant 0 : i32
    %c0_i32_1 = arith.constant 0 : i32
    return %arg0, %c0_i32, %c0_i32_0 : i32, i32, i32
  }
}

</mosaic_0001>

<bundles_post_ra>
// kernel: tpu_custom_call.1
= control target key start
LH: loop header
LB: loop body
LE: loop exit
PB: predicated region body
PF: predicated region fallthrough
CT: control target
= control target key end

     0   :  { %12 = vsyncpa [#allocation3], 0  ;;  %s874_s0 = inlined_call_operand.vmem [shape: f32[16,128], index: 0, kind: input, shape index: {}]   ;;  %s875_s1 = inlined_call_operand.hbm [shape: f32[16,128], index: 1, kind: input, shape index: {}]   ;;  %s876_s2 = inlined_call_operand.vmem [shape: f32[1,16], index: 2, kind: input, shape index: {}]   ;;  %s877_s3 = inlined_call_operand.vmem [shape: f32[16,1], index: 3, kind: input, shape index: {}]   ;;  %s878_s4 = inlined_call_operand.vmem [shape: f32[2,1,1], index: 4, kind: output, shape index: {0}]   ;;  %s879_s5 = inlined_call_operand.vmem [shape: f32[2,1,1], index: 5, kind: output, shape index: {1}]   ;;  %s880_s6 = inlined_call_operand.hbm [shape: f32[2,1,16], index: 6, kind: output, shape index: {2}]  }
   0x1   :  { %13 = vsyncpa [#allocation4], 0 }
   0x2   :  { %15 = vsyncpa [#allocation4 + $0x1], 0  ;;  %s753_s21 = smov 0   ;;  %s755_s22 = smov 0  }
   0x3   :  { %s757_s23 = smov 0   ;;  %s759_s24 = smov 0  }
   0x4 LB: > { %s774_s25 = sadd.s32 4294967295, %s713_s24   ;;  %s545_s26 = sadd.s32 4294967294, %s713_s24   ;;  %s713_s24 = sphi %s759_s24, %s886_s24   ;;  %s709_s23 = sphi %s757_s23, %s885_s23   ;;  %s705_s22 = sphi %s755_s22, %s884_s22   ;;  %s701_s21 = sphi %s753_s21, %s883_s21  }
   0x5   : > { %s778_s27 = sadd.s32 1, %s713_s24   ;;  %s174_s28 = sadd.s32 1, %s709_s23 }
   0x6   : > { %s171_s29 = ssub.s32 %s713_s24, %s778_s27  ;;  %p184_p0 = scmp.ne.s32.totalorder %s709_s23, %s705_s22 }
   0x7   : > { %p172_p1 = scmp.eq.s32.totalorder %s171_s29, 0  ;;  %p185_p2 = scmp.eq.s32.totalorder %s774_s25, 1 }
   0x8   : > { %p190_p3 = scmp.ne.s32.totalorder %s705_s22, %s701_s21  ;;  %p191_p4 = scmp.eq.s32.totalorder %s545_s26, 1 }
   0x9   : > { %s789_s30 = scalar_select %p172_p1, %s709_s23, %s174_s28  }
   0xa   : > { %p791_p5 = por %p185_p2, %p184_p0  ;;  %p795_p6 = por %p191_p4, %p190_p3 }
   0xb   : > { %p546_p7 = scmp.ge.s32.totalorder %s713_s24, 1  ;;  %p198_p8 = scmp.lt.s32.totalorder %s713_s24, 3 }
   0xc   : > { %p570_p9 = scmp.eq.s32.totalorder %s774_s25, 0  ;;  %s209_s11 = sshll.u32 %s875_s1, 4  ;;  %s210_s11 = int_to_ptr.hbm [resolvable:$true] %s209_s11 }
   0xd   : > { %p199_p10 = pnand %p546_p7, %p198_p8  ;;  %s715_s12 = smov [#allocation2]  }
   0xe   : > { %s211_s13 = sshll.u32 %s715_s12, 4  ;;  %s716_s14 = smov 128   ;;  %s212_s13 = int_to_ptr.vmem [resolvable:$true] %s211_s13 }
   0xf   : > { %p562_p11 = pneg %p199_p10  ;;  %s717_s15 = smov 8  }
  0x10   : > { %244 = sbr.rel (%p199_p10) target bundleno = 342 (0x156), region = 36 }
  0x11   : > { %p563_p12 = pnand %p570_p9, %p562_p11 }
  0x13   : > { %565 = dma.hbm_to_vmem [thread:$0]  (!%p563_p12), %s210_s11, 256, %s212_s13, [#allocation3], %s716_s14, %s716_s14, %s717_s15  }
  0x15   : > { %692 = dma.done.wait (%p570_p9), [#allocation3], 256  }
  0x16   : > { %694 = vsyncadd (%p570_p9), [#allocation3], 4294967040  ;;  %p283_p13 = scmp.lt.s32.totalorder %s774_s25, 1  ;;  %s553_s16 = sshll.u32 %s774_s25, 3  ;;  %v299_v1 = vld [vmem:[#allocation2 + $0x8] sm:$0xff]  ;;  %v298_v4 = vld [vmem:[#allocation2] sm:$0xff] }
  0x17   : > { %345 = vmatpush.xpose.msra.mxu0 %v299_v1  ;;  %s366_s28 = scalar_lea.vmem [#allocation2], %s553_s16  ;;  %v608_v29 = vld [vmem:[%s876_s2] ss:$0 sm:$0xff]  ;;  %vm375_vm6 = vcmask 7168   ;;  %vm359_vm7 = vcmask 130048   ;;  %vm383_vm8 = vcmask 0   ;;  %s422_s20 = scalar_lea.hbm %s880_s6, %s774_s25 }
  0x18   : > { %s814_s17 = scalar_select %p283_p13, %s774_s25, 1  ;;  %v367_v3 = vld [vmem:[%s366_s28] sm:$0xff]  ;;  %vm399_vm9 = vcmask 122880  }
  0x19   : > { %s281_s16 = sand.u32 1, %s705_s22   ;;  %s426_s29 = sshll.u32 %s422_s20, 4  ;;  %s427_s29 = int_to_ptr.hbm [resolvable:$true] %s426_s29 }
  0x1a   : > { %s551_s18 = sshll.u32 %s814_s17, 3  ;;  %s296_s15 = scalar_lea.vmem %s879_s5, %s814_s17 }
  0x1b   : > { %s286_s26 = scalar_lea.vmem %s874_s0, %s551_s18  ;;  %346 = vmatpush.xpose.msra.mxu0 %v298_v4  ;;  %s290_s10 = scalar_lea.vmem %s877_s3, %s551_s18 }
  0x1c   : > { %v297_v0 = vld [vmem:[%s286_s26] sm:$0xff]  ;;  %s282_s26 = scalar_lea.vmem [#allocation5], %s281_s16  ;;  %s408_s9 = scalar_lea.sflag [#allocation4], %s281_s16 }
  0x1d   : > { %v300_v2 = vmul.f32 %v297_v0, %v297_v0  ;;  %v368_v5 = vmul.f32 %v367_v3, %v297_v0  ;;  %v372_v30 = vld [vmem:[%s290_s10] sm:$0xff]  ;;  %s424_s28 = sshll.u32 %s282_s26, 4  ;;  %s661_s10 = sshra.s32 %s427_s29, 4  ;;  %s425_s28 = int_to_ptr.vmem [resolvable:$true] %s424_s28  ;;  %s662_s10 = int_to_ptr.hbm [resolvable:$true] %s661_s10 }
  0x1e   : > { %347 = vmatmul.f32.vlgmr.msra.gmra.mxu0 %v297_v0  ;;  %s663_s11 = scalar_lea.hbm %s662_s10, 1  ;;  %s667_s14 = scalar_lea.hbm %s880_s6, 2 }
  0x1f   : > { %301 = vadd.xlane.f32.xlu0 %v300_v2  ;;  %369 = vadd.xlane.f32.xlu1 %v368_v5  ;;  %p664_p0 = scmp.ne.s32.totalorder %s662_s10, %s663_s11  ;;  %p668_p3 = scmp.lt.s32.totalorder %s662_s10, %s880_s6 }
  0x20   : > { %p669_p4 = scmp.lt.s32.totalorder %s667_s14, %s663_s11 }
  0x21   : > { %p665_p1 = pnand %p664_p0, %p791_p5 }
  0x22   : > { %p670_p7 = por %p669_p4, %p668_p3 }
  0x23   : > { %p666_p2 = pneg %p665_p1 }
  0x25   : > { %p671_p8 = pnand %p670_p7, %p666_p2 }
  0x92   : > { %v302_v6 = vpop.xlane.xlu0 %301  ;;  %v370_v25 = vpop.xlane.xlu1 %369 }
  0x93   : > { %609 = vrsqrt.f32 %v302_v6  ;;  %vm310_vm0 = vcmp.eq.f32.partialorder %v302_v6, inf  ;;  %v313_v14 = vand.u32 2147483648, %v302_v6  ;;  %vm312_vm1 = vcmp.eq.f32.partialorder %v302_v6, 0.0 }
  0x99   : > { %v610_v7 = vpop.eup %609 }
  0x9a   : > { %v304_v8 = vmul.f32 %v610_v7, %v302_v6 }
  0x9b   : > { %v348_v27 = vpop.f32.mrf.mxu0 }
  0x9c   : > { %v305_v9 = vmul.f32 %v610_v7, %v304_v8 }
  0x9e   : > { %v306_v10 = vmul.f32 0.5, %v305_v9 }
  0xa0   : > { %v307_v11 = vsub.f32 1.5, %v306_v10 }
  0xa2   : > { %v308_v12 = vmul.f32 %v610_v7, %v307_v11 }
  0xa4   : > { %v309_v13 = vmul.f32 %v308_v12, %v302_v6 }
  0xa6   : > { %v311_v15 = vsel %vm310_vm0, %v302_v6, %v309_v13 }
  0xa7   : > { %v314_v16 = vsel %vm312_vm1, %v313_v14, %v311_v15 }
  0xa8   : > { %v315_v17 = vmax.f32 %v314_v16, 1e-08 }
  0xaa   : > { %611 = vrcp.f32 %v315_v17  ;;  %v327_v21 = vand.u32 2147483648, %v315_v17  ;;  %v325_v23 = vand.u32 2147483647, %v315_v17  ;;  %vm321_vm3 = vweird.f32 %v315_v17 }
  0xac   : > { %v328_v26 = vor.u32 1.1754944e-38, %v327_v21  ;;  %vm326_vm5 = vcmp.eq.f32.partialorder %v325_v23, 8.507059e+37 }
  0xb0   : > { %v612_v18 = vpop.eup %611 }
  0xb1   : > { %v317_v19 = vmul.f32 %v612_v18, %v315_v17  ;;  %vm322_vm2 = vweird.f32 %v612_v18 }
  0xb2   : > { %vm323_vm4 = vmor %vm321_vm3, %vm322_vm2 }
  0xb3   : > { %v318_v20 = vsub.f32 1.0, %v317_v19 }
  0xb5   : > { %v319_v22 = vmul.f32 %v612_v18, %v318_v20 }
  0xb7   : > { %v320_v24 = vadd.f32 %v612_v18, %v319_v22 }
  0xb9   : > { %v324_v28 = vsel %vm323_vm4, %v612_v18, %v320_v24 }
  0xba   : > { %v329_v31 = vsel %vm326_vm5, %v328_v26, %v324_v28 }
  0xbb   : > { %v371_v32 = vmul.f32 %v370_v25, %v329_v31  ;;  %v351_v33 = vmul.f32 %v348_v27, %v329_v31 }
  0xbd   : > { %v373_v34 = vmul.f32 %v372_v30, %v371_v32  ;;  %v356_v35 = vmul.f32 %v608_v29, %v351_v33 }
  0xbf   : > { %v385_v36 = vsel %vm375_vm6, %v373_v34, 0.0  ;;  %v357_v37 = vmul.f32 1.442695, %v356_v35 }
  0xc0   : > { %v386_v38 = vrot.slane %v385_v36, 4 }
  0xc1   : > { %613 = vpow2.f32 %v357_v37 }
  0xc2   : > { %v387_v39 = vadd.f32 %v386_v38, %v385_v36 }
  0xc4   : > { %v388_v40 = vrot.slane %v387_v39, 2 }
  0xc6   : > { %v389_v41 = vadd.f32 %v388_v40, %v387_v39 }
  0xc7   : > { %v614_v42 = vpop.eup %613 }
  0xc8   : > { %v390_v43 = vrot.slane %v389_v41, 1  ;;  %v360_v44 = vsel %vm359_vm7, %v614_v42, 0.0 }
  0xc9   : > { %361 = vadd.xlane.f32.xlu0 %v360_v44  ;;  %v393_v45 = vrot.slane %v360_v44, 4 }
  0xca   : > { %v391_v46 = vadd.f32 %v390_v43, %v389_v41 }
  0xcb   : > { %v394_v47 = vadd.f32 %v393_v45, %v360_v44 }
  0xcc   : > { %392 = vst.msk [vmem:[%s296_s15] sm:$0x1] %vm383_vm8, %v391_v46 }
  0xcd   : > { %v395_v48 = vrot.slane %v394_v47, 2 }
  0xcf   : > { %v396_v49 = vadd.f32 %v395_v48, %v394_v47 }
  0xd1   : > { %v397_v50 = vrot.slane %v396_v49, 1 }
  0xd3   : > { %v398_v51 = vadd.f32 %v397_v50, %v396_v49 }
  0xd5   : > { %400 = vst.msk [vmem:[%s282_s26] sm:$0x1] %vm399_vm9, %v398_v51 }
  0xd6   : > { %674 = shalt.err (!%p671_p8)
}
  0xd7   : > { %560 = dma.vmem_to_hbm [thread:$0]  (%p791_p5), %s425_s28, 16, %s427_s29, %s408_s9  }
  0xd8   : > { %s293_s19 = scalar_lea.vmem %s878_s4, %s814_s17 }
 0x13c   : > { %v362_v52 = vpop.xlane.xlu0 %361 }
 0x13d   : > { %615 = vlog2.f32 %v362_v52 }
 0x143   : > { %v616_v53 = vpop.eup %615 }
 0x144   : > { %v364_v54 = vmul.f32 0.6931472, %v616_v53 }
 0x146   : > { %v374_v55 = vsub.f32 %v364_v54, %v373_v34 }
 0x148   : > { %v376_v56 = vsel %vm375_vm6, %v374_v55, 0.0 }
 0x149   : > { %v377_v57 = vrot.slane %v376_v56, 4 }
 0x14b   : > { %v378_v58 = vadd.f32 %v377_v57, %v376_v56 }
 0x14d   : > { %v379_v59 = vrot.slane %v378_v58, 2 }
 0x14f   : > { %v380_v60 = vadd.f32 %v379_v59, %v378_v58 }
 0x151   : > { %v381_v61 = vrot.slane %v380_v60, 1 }
 0x153   : > { %v382_v62 = vadd.f32 %v381_v61, %v380_v60 }
 0x155   : > { %384 = vst.msk [vmem:[%s293_s19] sm:$0x1] %vm383_vm8, %v382_v62 }
 0x156 PF: > { %p572_p5 = scmp.ge.s32.totalorder %s713_s24, 2  ;;  %s450_s7 = sand.u32 1, %s701_s21  }
 0x157   : > { %s451_s20 = scalar_lea.sflag [#allocation4], %s450_s7 }
 0x158   : > { %p567_p9 = pnand %p572_p5, %p795_p6 }
 0x15a   : > { %p568_p10 = pneg %p567_p9 }
 0x15c   : > { %696 = dma.done.wait (%p568_p10), %s451_s20, 16  }
 0x15d   : > { %698 = vsyncadd (%p568_p10), %s451_s20, 4294967280  ;;  %p18_p11 = scmp.ge.s32.totalorder %s778_s27, 4   ;;  %s883_s21 = smov %s705_s22 }
 0x15e   : > { %s884_s22 = smov %s709_s23  ;;  %s885_s23 = smov %s789_s30 }
 0x15f   : > { %s886_s24 = smov %s778_s27  ;;  %20 = sbr.rel (!%p18_p11) target bundleno = 4 (0x4), region = 104 }
 0x164   :  { %456 = vsyncpa [#allocation3], 1 }
 0x165   :  { %458 = vsyncpa [#allocation3 + $0x1], 1 }
 0x166   :  { %459 = vsyncpa [#allocation4], 1 }
 0x167   :  { %461 = vsyncpa [#allocation4 + $0x1], 1 }

</bundles_post_ra>
